<compile_context>
chip_gen: v7x
topology: tpu7x:2x2x1
jax: 0.10.0
libtpu: 0.0.40
codegen_flags: <defaults>
</compile_context>

<pallas_src>
import jax
import jax.numpy as jnp
from jax.experimental import pallas as pl
from jax.experimental.pallas import tpu as pltpu


def _chained_sum_kernel(x_ref, o_ref, acc_ref):
    r0 = pl.program_id(1)          # reduction step over original dim 0
    r2 = pl.program_id(2)          # reduction step over original dim 2
    n0 = pl.num_programs(1)
    n2 = pl.num_programs(2)

    @pl.when(jnp.logical_and(r0 == 0, r2 == 0))
    def _init():
        acc_ref[...] = jnp.zeros_like(acc_ref)

    # Fused upcast + reduce over the block's local copies of original dims
    # 0 and 2: pure per-vreg VPU adds, trailing (d3, d4) layout never changes
    # -> no relayout / no materialized f32 copy of the whole block.
    acc_ref[...] += jnp.sum(x_ref[...], axis=(0, 2), dtype=jnp.float32)

    @pl.when(jnp.logical_and(r0 == n0 - 1, r2 == n2 - 1))
    def _finalize():
        # Single cross-lane (XLU) reduce over the last axis, done once on the
        # small f32 accumulator, then cast back to the output dtype.
        o_ref[...] = jnp.sum(acc_ref[...], axis=-1).astype(o_ref.dtype)


def _largest_divisor_leq(n, cap):
    cap = int(max(1, min(n, cap)))
    for d in range(cap, 0, -1):
        if n % d == 0:
            return d
    return 1


def _divisors_multiple_of_8(n):
    return [d for d in range(8, n + 1, 8) if n % d == 0]


def _tensorcores_per_chip():
    # Only v7x has 2 TensorCores per chip; splitting the "parallel" d1 axis
    # only pays off there.  Detection failure -> 1 (no split: safe default).
    try:
        kind = jax.devices()[0].device_kind.lower()
        if "v7" in kind:
            return 2
    except Exception:
        pass
    return 1


def _pick_tiling(shape, in_itemsize, out_itemsize, block_bytes_target,
                 vmem_budget_bytes, num_cores):
    d0, d1, d2, d3, d4 = shape
    row_bytes = d3 * d4 * in_itemsize          # one (1, 1, 1, d3, d4) slab

    def fixed_bytes(b1):
        acc = b1 * d3 * d4 * 4                 # f32 accumulator (resident)
        out = 2 * b1 * d3 * out_itemsize       # double-buffered output block
        return acc + out

    # ---- choose b1 (output / "parallel" axis block) ------------------------
    b1 = d1
    if num_cores >= 2:
        # Split d1 across TensorCores when a multiple-of-8 divisor < d1 exists
        # (keeps the (8, 128) output-tiling rule satisfied, >= 2 blocks).
        cands = [d for d in _divisors_multiple_of_8(d1) if d < d1]
        if cands:
            b1 = max(cands)
    # Shrink b1 further (multiples of 8 dividing d1) until 2x a minimal input
    # block + accumulator + output fits the VMEM budget.
    while (2 * b1 * row_bytes + fixed_bytes(b1)) > vmem_budget_bytes:
        smaller = [d for d in _divisors_multiple_of_8(d1) if d < b1]
        if not smaller:
            break
        b1 = max(smaller)

    slice_bytes = max(1, b1 * row_bytes)       # one (1, b1, 1, d3, d4) slab
    block_budget = min(block_bytes_target,
                       max(slice_bytes,
                           (vmem_budget_bytes - fixed_bytes(b1)) // 2))
    budget_slices = max(1, block_budget // slice_bytes)

    # Dim 2 is adjacent in HBM (stride d3*d4): maximize b2 FIRST so each DMA
    # run is as long/contiguous as possible, then fill the budget with b0.
    b2 = _largest_divisor_leq(d2, budget_slices)
    b0 = _largest_divisor_leq(d0, budget_slices // b2)
    return b0, b1, b2


def chained_sum(x, *, block_bytes_target=12 << 20, vmem_budget_bytes=36 << 20):
    """Equivalent of the torch loop: sum over original axes 0, 2, 4."""
    assert x.ndim == 5, "Model.forward requires a rank-5 input to be valid"
    # TODO(synk): torch.sum promotes integer inputs to int64; this kernel
    # accumulates in f32 and casts back to x.dtype (exact for f32/bf16).
    d0, d1, d2, d3, d4 = x.shape
    in_itemsize = jnp.dtype(x.dtype).itemsize
    out_itemsize = in_itemsize

    b0, b1, b2 = _pick_tiling(
        x.shape, in_itemsize, out_itemsize,
        block_bytes_target, vmem_budget_bytes, _tensorcores_per_chip())
    g1, g0, g2 = d1 // b1, d0 // b0, d2 // b2

    # VMEM accounting: 2x input block (double buffer) + f32 acc + 2x out block.
    block_bytes = b0 * b1 * b2 * d3 * d4 * in_itemsize
    acc_bytes = b1 * d3 * d4 * 4
    out_bytes = 2 * b1 * d3 * out_itemsize
    vmem_usage = 2 * block_bytes + acc_bytes + out_bytes
    vmem_limit = int(min(100 << 20, max(16 << 20, vmem_usage + (8 << 20))))

    flops = x.size                                   # ~one add per element
    bytes_accessed = x.size * in_itemsize + d1 * d3 * out_itemsize

    return pl.pallas_call(
        _chained_sum_kernel,
        out_shape=jax.ShapeDtypeStruct((d1, d3), x.dtype),
        grid_spec=pltpu.PrefetchScalarGridSpec(
            num_scalar_prefetch=0,
            grid=(g1, g0, g2),
            in_specs=[
                pl.BlockSpec(
                    (b0, b1, b2, d3, d4),
                    lambda i1, i0, i2: (i0, i1, i2, 0, 0),
                ),
            ],
            out_specs=pl.BlockSpec((b1, d3), lambda i1, i0, i2: (i1, 0)),
            scratch_shapes=[pltpu.VMEM((b1, d3, d4), jnp.float32)],
        ),
        compiler_params=pltpu.CompilerParams(
            # d1-blocks are independent (megacore-parallel on v7x);
            # dims 0 / 2 are the streamed reduction axes (innermost).
            dimension_semantics=("parallel", "arbitrary", "arbitrary"),
            vmem_limit_bytes=vmem_limit,
        ),
        cost_estimate=pl.CostEstimate(
            flops=flops, transcendentals=0, bytes_accessed=bytes_accessed
        ),
    )(x)


if __name__ == "__main__":
    key = jax.random.PRNGKey(0)

    # Test 1: small rank-5 input (fits a single grid step).
    x = jax.random.normal(key, (2, 4, 3, 8, 128), dtype=jnp.float32)
    out = chained_sum(x)
    jax.block_until_ready(out)
    ref = jnp.sum(x, axis=(0, 2, 4))
    assert out.shape == (4, 8), out.shape
    assert jnp.allclose(out, ref, atol=1e-3, rtol=1e-3)

    # Test 2: tiny block budget to exercise the gridded, double-buffered
    # accumulation path (multiple reduction steps, possible d1 split on v7x).
    k2 = jax.random.PRNGKey(1)
    x2 = jax.random.normal(k2, (4, 16, 6, 8, 128), dtype=jnp.float32)
    out2 = chained_sum(x2, block_bytes_target=32 << 10)
    jax.block_until_ready(out2)
    ref2 = jnp.sum(x2, axis=(0, 2, 4))
    assert out2.shape == (16, 8), out2.shape
    assert jnp.allclose(out2, ref2, atol=1e-3, rtol=1e-3)

    print("KERNEL_OK")
</pallas_src>

<mosaic_0001>
module attributes {stable_mosaic.version = 11 : i64} {
  func.func @_chained_sum_kernel(%arg0: i32, %arg1: i32, %arg2: i32, %arg3: memref<2x4x3x8x128xf32, #tpu.memory_space<vmem>>, %arg4: memref<4x8xf32, #tpu.memory_space<vmem>>, %arg5: memref<4x8x128xf32, #tpu.memory_space<vmem>>) attributes {dimension_semantics = [#tpu.dimension_semantics<parallel>, #tpu.dimension_semantics<arbitrary>, #tpu.dimension_semantics<arbitrary>], iteration_bounds = array<i64: 1, 1, 1>, scalar_prefetch = 0 : i64, scratch_operands = 1 : i64, tpu.core_type = #tpu.core_type<tc>, window_params = [{transform_indices = @transform_0, window_bounds = array<i64: 2, 4, 3, 8, 128>}, {transform_indices = @transform_1, window_bounds = array<i64: 4, 8>}]} {
    %c0_i32 = arith.constant 0 : i32
    %0 = arith.cmpi eq, %arg1, %c0_i32 : i32
    %c0_i32_0 = arith.constant 0 : i32
    %1 = arith.cmpi eq, %arg2, %c0_i32_0 : i32
    %2 = arith.andi %0, %1 : i1
    %3 = arith.extui %2 : i1 to i32
    %c0_i32_1 = arith.constant 0 : i32
    %4 = arith.cmpi ne, %3, %c0_i32_1 : i32
    scf.if %4 {
      %cst_15 = arith.constant 0.000000e+00 : f32
      %15 = vector.broadcast %cst_15 : f32 to vector<4x8x128xf32>
      %c0_16 = arith.constant 0 : index
      %c0_17 = arith.constant 0 : index
      %c0_18 = arith.constant 0 : index
      %16 = vector.load %arg5[%c0_16, %c0_17, %c0_18] : memref<4x8x128xf32, #tpu.memory_space<vmem>>, vector<4x8x128xf32>
      tpu.vector_store %arg5[%c0_16, %c0_17, %c0_18], %15 {strides = array<i32>} : memref<4x8x128xf32, #tpu.memory_space<vmem>>, vector<4x8x128xf32>,
    } else {
    }
    %c0 = arith.constant 0 : index
    %c0_2 = arith.constant 0 : index
    %c0_3 = arith.constant 0 : index
    %5 = vector.load %arg5[%c0, %c0_2, %c0_3] : memref<4x8x128xf32, #tpu.memory_space<vmem>>, vector<4x8x128xf32>
    %c0_4 = arith.constant 0 : index
    %c0_5 = arith.constant 0 : index
    %c0_6 = arith.constant 0 : index
    %c0_7 = arith.constant 0 : index
    %c0_8 = arith.constant 0 : index
    %6 = vector.load %arg3[%c0_4, %c0_5, %c0_6, %c0_7, %c0_8] : memref<2x4x3x8x128xf32, #tpu.memory_space<vmem>>, vector<2x4x3x8x128xf32>
    %cst = arith.constant dense<0.000000e+00> : vector<4x8x128xf32>
    %7 = vector.multi_reduction <add>, %6, %cst [0, 2] : vector<2x4x3x8x128xf32> to vector<4x8x128xf32>
    %8 = arith.addf %5, %7 : vector<4x8x128xf32>
    %c0_9 = arith.constant 0 : index
    %c0_10 = arith.constant 0 : index
    %c0_11 = arith.constant 0 : index
    %9 = vector.load %arg5[%c0_9, %c0_10, %c0_11] : memref<4x8x128xf32, #tpu.memory_space<vmem>>, vector<4x8x128xf32>
    tpu.vector_store %arg5[%c0_9, %c0_10, %c0_11], %8 {strides = array<i32>} : memref<4x8x128xf32, #tpu.memory_space<vmem>>, vector<4x8x128xf32>,
    %c0_i32_12 = arith.constant 0 : i32
    %10 = arith.cmpi eq, %arg1, %c0_i32_12 : i32
    %c0_i32_13 = arith.constant 0 : i32
    %11 = arith.cmpi eq, %arg2, %c0_i32_13 : i32
    %12 = arith.andi %10, %11 : i1
    %13 = arith.extui %12 : i1 to i32
    %c0_i32_14 = arith.constant 0 : i32
    %14 = arith.cmpi ne, %13, %c0_i32_14 : i32
    scf.if %14 {
      %c0_15 = arith.constant 0 : index
      %c0_16 = arith.constant 0 : index
      %c0_17 = arith.constant 0 : index
      %15 = vector.load %arg5[%c0_15, %c0_16, %c0_17] : memref<4x8x128xf32, #tpu.memory_space<vmem>>, vector<4x8x128xf32>
      %cst_18 = arith.constant dense<0.000000e+00> : vector<4x8xf32>
      %16 = vector.multi_reduction <add>, %15, %cst_18 [2] : vector<4x8x128xf32> to vector<4x8xf32>
      %c0_19 = arith.constant 0 : index
      %c0_20 = arith.constant 0 : index
      %17 = vector.load %arg4[%c0_19, %c0_20] : memref<4x8xf32, #tpu.memory_space<vmem>>, vector<4x8xf32>
      tpu.vector_store %arg4[%c0_19, %c0_20], %16 {strides = array<i32>} : memref<4x8xf32, #tpu.memory_space<vmem>>, vector<4x8xf32>,
    } else {
    }
    return
  }
  func.func @transform_0(%arg0: i32, %arg1: i32, %arg2: i32) -> (i32, i32, i32, i32, i32) {
    %c0_i32 = arith.constant 0 : i32
    %c0_i32_0 = arith.constant 0 : i32
    %c0_i32_1 = arith.constant 0 : i32
    return %arg1, %arg0, %arg2, %c0_i32, %c0_i32_0 : i32, i32, i32, i32, i32
  }
  func.func @transform_1(%arg0: i32, %arg1: i32, %arg2: i32) -> (i32, i32) {
    %c0_i32 = arith.constant 0 : i32
    %c0_i32_0 = arith.constant 0 : i32
    return %arg0, %c0_i32 : i32, i32
  }
}

</mosaic_0001>

<bundles_post_ra>
// kernel: tpu_custom_call.1
= control target key start
LH: loop header
LB: loop body
LE: loop exit
PB: predicated region body
PF: predicated region fallthrough
CT: control target
= control target key end

     0   :  { %6 = vsyncpa [#allocation4], 0  ;;  %s239_s0 = inlined_call_operand.hbm [shape: f32[2,4,3,8,128], index: 0, kind: input, shape index: {}]   ;;  %s240_s1 = inlined_call_operand.hbm [shape: f32[4,8], index: 1, kind: output, shape index: {}]  }
   0x1   :  { %7 = vsyncpa [#allocation5], 0  ;;  %s201_s6 = smov [#allocation3]   ;;  %s153_s10 = scalar_lea.hbm %s239_s0, 3072 }
   0x2   :  { %s13_s7 = sshll.u32 %s201_s6, 4  ;;  %p154_p0 = scmp.ne.s32.totalorder %s239_s0, %s153_s10  ;;  %s14_s7 = int_to_ptr.vmem [resolvable:$true] %s13_s7 }
   0x3   :  { %p157_p1 = scmp.lt.u32.totalorder %s153_s10, %s239_s0 }
   0x5   :  { %p159_p2 = pnand %p157_p1, %p154_p0 }
   0x7   :  { %162 = shalt.err (!%p159_p2)
}
   0x8   :  { %s163_s15 = scalar_lea.vmem %s14_s7, 3072  ;;  %p168_p4 = scmp.lt.s32.totalorder %s14_s7, %s14_s7 }
   0x9   :  { %p164_p3 = scmp.ne.s32.totalorder %s14_s7, %s163_s15  ;;  %p169_p5 = scmp.lt.s32.totalorder %s163_s15, %s163_s15 }
   0xb   :  { %p170_p6 = por %p169_p5, %p168_p4 }
   0xd   :  { %p171_p7 = pnand %p170_p6, %p164_p3 }
   0xf   :  { %174 = shalt.err (!%p171_p7)
}
  0x10   :  { %s202_s16 = smov 128   ;;  %s203_s17 = smov 8  }
  0x11   :  { %19 = dma.hbm_to_vmem [thread:$0]  %s239_s0, 3072, %s14_s7, [#allocation4], %s202_s16, %s202_s16, %s203_s17  }
  0x12   :  { %197 = dma.done.wait [#allocation4], 3072  }
  0x13   :  { %198 = vsyncadd [#allocation4], 4294964224  ;;  %v37_v0 = vld [vmem:[#allocation3] sm:$0xff]  ;;  %v38_v1 = vld [vmem:[#allocation3 + $0x8] sm:$0xff]  ;;  %v107_v44 = vlaneseq  ;;  %vm125_vm0 = vcmask 1041409   ;;  %vm127_vm1 = vcmask 1042434  }
  0x14   :  { %v39_v2 = vld [vmem:[#allocation3 + $0x10] sm:$0xff]  ;;  %v49_v3 = vld [vmem:[#allocation3 + $0x60] sm:$0xff]  ;;  %v61_v4 = vadd.f32 %v38_v1, %v37_v0  ;;  %v44_v6 = vld [vmem:[#allocation3 + $0x38] sm:$0xff]  ;;  %s204_s0 = smov [#allocation6]   ;;  %vm129_vm2 = vcmask 1043459   ;;  %vm132_vm3 = vcmask 60416  }
  0x15   :  { %v43_v5 = vld [vmem:[#allocation3 + $0x30] sm:$0xff]  ;;  %v45_v7 = vld [vmem:[#allocation3 + $0x40] sm:$0xff]  ;;  %v50_v8 = vld [vmem:[#allocation3 + $0x68] sm:$0xff]  ;;  %v108_v45 = vand.u32 127, %v107_v44  ;;  %v110_v46 = vshrl.u32 %v107_v44, 7  ;;  %s140_s20 = sshll.u32 %s204_s0, 4  ;;  %s141_s20 = int_to_ptr.vmem [resolvable:$true] %s140_s20 }
  0x16   :  { %v62_v9 = vadd.f32 %v61_v4, %v39_v2  ;;  %v55_v10 = vld [vmem:[#allocation3 + $0x90] sm:$0xff]  ;;  %v71_v11 = vadd.f32 %v44_v6, %v43_v5  ;;  %v40_v12 = vld [vmem:[#allocation3 + $0x18] sm:$0xff]  ;;  %v41_v13 = vld [vmem:[#allocation3 + $0x20] sm:$0xff]  ;;  %s175_s21 = scalar_lea.vmem %s141_s20, 64  ;;  %p180_p9 = scmp.lt.s32.totalorder %s141_s20, %s141_s20 }
  0x17   :  { %v42_v14 = vld [vmem:[#allocation3 + $0x28] sm:$0xff]  ;;  %v51_v15 = vld [vmem:[#allocation3 + $0x70] sm:$0xff]  ;;  %v56_v17 = vld [vmem:[#allocation3 + $0x98] sm:$0xff]  ;;  %v66_v20 = vadd.f32 %v41_v13, %v40_v12  ;;  %v111_v48 = vsub.s32 %v108_v45, %v110_v46  ;;  %p176_p8 = scmp.ne.s32.totalorder %s141_s20, %s175_s21  ;;  %p181_p10 = scmp.lt.s32.totalorder %s175_s21, %s175_s21 }
  0x18   :  { %v63_v16 = vadd.f32 %v62_v9, %v49_v3  ;;  %v72_v18 = vadd.f32 %v71_v11, %v45_v7  ;;  %v52_v19 = vld [vmem:[#allocation3 + $0x78] sm:$0xff]  ;;  %v46_v21 = vld [vmem:[#allocation3 + $0x48] sm:$0xff]  ;;  %v47_v22 = vld [vmem:[#allocation3 + $0x50] sm:$0xff] }
  0x19   :  { %v48_v23 = vld [vmem:[#allocation3 + $0x58] sm:$0xff]  ;;  %v67_v26 = vadd.f32 %v66_v20, %v42_v14  ;;  %v76_v27 = vadd.f32 %v47_v22, %v46_v21  ;;  %v57_v28 = vld [vmem:[#allocation3 + $0xa0] sm:$0xff]  ;;  %v58_v30 = vld [vmem:[#allocation3 + $0xa8] sm:$0xff]  ;;  %p182_p11 = por %p181_p10, %p180_p9 }
  0x1a   :  { %v64_v24 = vadd.f32 %v63_v16, %v50_v8  ;;  %v73_v25 = vadd.f32 %v72_v18, %v55_v10  ;;  %v53_v29 = vld [vmem:[#allocation3 + $0x80] sm:$0xff]  ;;  %v54_v35 = vld [vmem:[#allocation3 + $0x88] sm:$0xff]  ;;  %v59_v36 = vld [vmem:[#allocation3 + $0xb0] sm:$0xff] }
  0x1b   :  { %v68_v33 = vadd.f32 %v67_v26, %v52_v19  ;;  %v77_v34 = vadd.f32 %v76_v27, %v48_v23  ;;  %v60_v40 = vld [vmem:[#allocation3 + $0xb8] sm:$0xff]  ;;  %p183_p12 = pnand %p182_p11, %p176_p8 }
  0x1c   :  { %v65_v31 = vadd.f32 %v64_v24, %v51_v15  ;;  %v74_v32 = vadd.f32 %v73_v25, %v56_v17 }
  0x1d   :  { %v69_v38 = vadd.f32 %v68_v33, %v53_v29  ;;  %v78_v39 = vadd.f32 %v77_v34, %v58_v30 }
  0x1e   :  { %95 = vadd.xlane.f32.xlu0 %v65_v31  ;;  %v75_v37 = vadd.f32 %v74_v32, %v57_v28 }
  0x1f   :  { %v70_v41 = vadd.f32 %v69_v38, %v54_v35  ;;  %v79_v42 = vadd.f32 %v78_v39, %v59_v36 }
  0x20   :  { %99 = vadd.xlane.f32.xlu1 %v75_v37 }
  0x21   :  { %v80_v43 = vadd.f32 %v79_v42, %v60_v40 }
  0x22   :  { %97 = vadd.xlane.f32.xlu0 %v70_v41 }
  0x24   :  { %101 = vadd.xlane.f32.xlu1 %v80_v43 }
  0xab   :  { %v96_v47 = vpop.xlane.xlu0 %95 }
  0xac   :  { %v112_v51 = vrot.slane %v96_v47, %v111_v48 }
  0xad   :  { %v100_v49 = vpop.xlane.xlu1 %99 }
  0xae   :  { %v120_v53 = vrot.slane %v100_v49, %v111_v48 }
  0xaf   :  { %v98_v50 = vpop.xlane.xlu0 %97 }
  0xb0   :  { %v116_v52 = vrot.slane %v98_v50, %v111_v48 }
  0xb1   :  { %v102_v54 = vpop.xlane.xlu1 %101 }
  0xb2   :  { %v126_v55 = vsel %vm125_vm0, %v116_v52, %v112_v51  ;;  %v124_v56 = vrot.slane %v102_v54, %v111_v48 }
  0xb3   :  { %v128_v57 = vsel %vm127_vm1, %v120_v53, %v126_v55 }
  0xb4   :  { %v130_v58 = vsel %vm129_vm2, %v124_v56, %v128_v57 }
  0xb5   :  { %133 = vst.msk [vmem:[#allocation6] sm:$0xf] %vm132_vm3, %v130_v58 }
  0xb6   :  { %186 = shalt.err (!%p183_p12)
}
  0xb7   :  { %s187_s24 = scalar_lea.hbm %s240_s1, 64 }
  0xb8   :  { %p188_p13 = scmp.ne.s32.totalorder %s240_s1, %s187_s24  ;;  %p191_p0 = scmp.lt.u32.totalorder %s187_s24, %s240_s1 }
  0xba   :  { %p193_p1 = pnand %p191_p0, %p188_p13 }
  0xbc   :  { %196 = shalt.err (!%p193_p1)
}
  0xbd   :  { %143 = dma.vmem_to_hbm [thread:$0]  %s141_s20, 64, %s240_s1, [#allocation5]  }
  0xbe   :  { %199 = dma.done.wait [#allocation5], 64  }
  0xbf   :  { %200 = vsyncadd [#allocation5], 4294967232 }
  0xc0   :  { %147 = vsyncpa [#allocation4], 1 }
  0xc1   :  { %148 = vsyncpa [#allocation5], 1 }

</bundles_post_ra>
